<compile_context>
chip_gen: v5e
topology: v5e:2x2
jax: 0.10.0
libtpu: 0.0.40
codegen_flags: <defaults>
</compile_context>

<pallas_src>
import jax
import jax.numpy as jnp
from jax.experimental import pallas as pl
from jax.experimental.pallas import tpu as pltpu

IN_FEATURES = 784
HIDDEN = 64
HIDDEN_PAD = 128            # lane-dense hidden width
NUM_CLASSES = 10
CLASSES_PAD = 128           # lane-dense output width (sliced back to 10 outside)
NEG_PAD = -1e30             # bias pad for fake classes: exp(-1e30 - m) == 0 in f32
SUBLANE = 16                # bf16 sublane tile is (16, 128); also fine for f32


def _cdiv(a, b):
    return -(-a // b)


def _round_up(n, m):
    return _cdiv(n, m) * m


def mlp_kernel(x_ref,
               w1_ref, b1_ref,
               w2_ref, b2_ref,
               w3_ref, b3_ref,
               w4_ref, b4_ref,
               o_ref):
    cd = w1_ref.dtype   # streaming compute dtype: bf16 on the fast path, f32 for parity
    # fc1 + relu  (MXU matmul, f32 accumulation)
    h = jnp.dot(x_ref[...], w1_ref[...], preferred_element_type=jnp.float32) + b1_ref[...]
    h = jnp.maximum(h, 0.0)
    # fc2 + relu
    h = jnp.dot(h.astype(cd), w2_ref[...], preferred_element_type=jnp.float32) + b2_ref[...]
    h = jnp.maximum(h, 0.0)
    # fc3 + relu
    h = jnp.dot(h.astype(cd), w3_ref[...], preferred_element_type=jnp.float32) + b3_ref[...]
    h = jnp.maximum(h, 0.0)
    # fc4 (no activation); padded classes carry a -1e30 bias so they are inert below
    logits = jnp.dot(h.astype(cd), w4_ref[...], preferred_element_type=jnp.float32) + b4_ref[...]
    # log_softmax along the last axis over the full 128-lane vreg (numerically stable).
    # Padded lanes: logit = -1e30, z = -1e30 - m, exp(z) == 0 -> max / sum see only
    # the 10 real classes, so this equals log_softmax over 10 classes exactly.
    m = jnp.max(logits, axis=-1, keepdims=True)
    z = logits - m
    lse = jnp.log(jnp.sum(jnp.exp(z), axis=-1, keepdims=True))
    o_ref[...] = z - lse


def _pad_params(params, compute_dtype):
    """Zero-pad hidden 64->128 and classes 10->128 (lane-dense).

    Hidden pads are inert through relu/matmul.  Class pads get a -1e30 bias so
    log_softmax over 128 lanes equals log_softmax over the 10 real classes.
    Weights are cast to the streaming compute dtype; biases stay f32.
    """
    dh = HIDDEN_PAD - HIDDEN
    dc = CLASSES_PAD - NUM_CLASSES
    w1 = jnp.pad(params["w1"], ((0, 0), (0, dh))).astype(compute_dtype)
    b1 = jnp.pad(params["b1"], ((0, 0), (0, dh))).astype(jnp.float32)
    w2 = jnp.pad(params["w2"], ((0, dh), (0, dh))).astype(compute_dtype)
    b2 = jnp.pad(params["b2"], ((0, 0), (0, dh))).astype(jnp.float32)
    w3 = jnp.pad(params["w3"], ((0, dh), (0, dh))).astype(compute_dtype)
    b3 = jnp.pad(params["b3"], ((0, 0), (0, dh))).astype(jnp.float32)
    w4 = jnp.pad(params["w4"], ((0, dh), (0, dc))).astype(compute_dtype)
    b4 = jnp.pad(params["b4"].astype(jnp.float32), ((0, 0), (0, dc)),
                 constant_values=NEG_PAD)
    return w1, b1, w2, b2, w3, b3, w4, b4


def _choose_tb(batch, compute_dtype):
    """Pick the batch tile: big enough to amortize the ~0.35us per-step overhead,
    small enough for every generation's scoped-VMEM default without touching
    vmem_limit_bytes, >= 2 grid steps once B > 256 (so v7x's two TensorCores
    both get work), and derived from cdiv(B, n_steps) so ragged batches waste
    less than one sublane tile of padding."""
    max_tb = 2048 if compute_dtype == jnp.bfloat16 else 1024
    n_steps = _cdiv(batch, max_tb)
    if batch > 256:
        n_steps = max(n_steps, 2)
    tb = _round_up(_cdiv(batch, n_steps), SUBLANE)
    return max(SUBLANE, min(tb, max_tb))


def net_forward(x, params, *, tb=None, compute_dtype=jnp.bfloat16):
    """x: (B, 784) float32. params: dict of weights/biases. Returns (B, 10) f32 log-probs."""
    B = x.shape[0]
    max_tb = 2048 if compute_dtype == jnp.bfloat16 else 1024
    if tb is None:
        tb = _choose_tb(B, compute_dtype)
    tb = max(SUBLANE, min(_round_up(tb, SUBLANE), max_tb))

    # Pad batch to a multiple of the tile (rows are independent; sliced off below).
    B_pad = _round_up(max(B, tb), tb)
    if B_pad != B:
        x = jnp.pad(x, ((0, B_pad - B), (0, 0)))
    x = x.astype(compute_dtype)

    w1, b1, w2, b2, w3, b3, w4, b4 = _pad_params(params, compute_dtype)
    grid = (B_pad // tb,)

    # Resident (non-streamed) operands: constant index_map -> fetched once,
    # never re-DMA'd across grid steps.
    def resident(shape):
        return pl.BlockSpec(shape, lambda i: (0, 0))

    in_specs = [
        pl.BlockSpec((tb, IN_FEATURES), lambda i: (i, 0)),   # x: streamed batch tiles
        resident((IN_FEATURES, HIDDEN_PAD)), resident((1, HIDDEN_PAD)),
        resident((HIDDEN_PAD, HIDDEN_PAD)), resident((1, HIDDEN_PAD)),
        resident((HIDDEN_PAD, HIDDEN_PAD)), resident((1, HIDDEN_PAD)),
        resident((HIDDEN_PAD, CLASSES_PAD)), resident((1, CLASSES_PAD)),
    ]
    out_spec = pl.BlockSpec((tb, CLASSES_PAD), lambda i: (i, 0))

    wsize = jnp.dtype(compute_dtype).itemsize
    weight_bytes = (wsize * (IN_FEATURES * HIDDEN_PAD + 2 * HIDDEN_PAD * HIDDEN_PAD
                             + HIDDEN_PAD * CLASSES_PAD)
                    + 4 * (3 * HIDDEN_PAD + CLASSES_PAD))
    cost = pl.CostEstimate(
        flops=2 * B_pad * (IN_FEATURES * HIDDEN_PAD
                           + 2 * HIDDEN_PAD * HIDDEN_PAD
                           + HIDDEN_PAD * CLASSES_PAD),
        transcendentals=B_pad * CLASSES_PAD,
        bytes_accessed=wsize * B_pad * IN_FEATURES + 4 * B_pad * CLASSES_PAD + weight_bytes,
    )

    out = pl.pallas_call(
        mlp_kernel,
        out_shape=jax.ShapeDtypeStruct((B_pad, CLASSES_PAD), jnp.float32),
        grid=grid,
        in_specs=in_specs,
        out_specs=out_spec,
        compiler_params=pltpu.CompilerParams(
            dimension_semantics=("parallel",),   # batch axis shards across v7x's 2 TCs
        ),
        cost_estimate=cost,
    )(x, w1, b1, w2, b2, w3, b3, w4, b4)

    return out[:B, :NUM_CLASSES]


def init_params(key):
    """Deterministic PyTorch-style Linear init: U(-1/sqrt(fan_in), 1/sqrt(fan_in)).
    Weights stored as (in_features, out_features) so the kernel computes x @ W + b,
    matching PyTorch's x @ W_pt.T + b."""
    dims = [(IN_FEATURES, HIDDEN), (HIDDEN, HIDDEN), (HIDDEN, HIDDEN), (HIDDEN, NUM_CLASSES)]
    params = {}
    keys = jax.random.split(key, 2 * len(dims))
    for i, (fan_in, fan_out) in enumerate(dims):
        bound = 1.0 / (fan_in ** 0.5)
        params[f"w{i+1}"] = jax.random.uniform(keys[2 * i], (fan_in, fan_out),
                                               minval=-bound, maxval=bound, dtype=jnp.float32)
        params[f"b{i+1}"] = jax.random.uniform(keys[2 * i + 1], (1, fan_out),
                                               minval=-bound, maxval=bound, dtype=jnp.float32)
    return params


def reference_forward(x, params):
    """Pure-JAX f32 reference for correctness check."""
    h = jnp.maximum(x @ params["w1"] + params["b1"], 0.0)
    h = jnp.maximum(h @ params["w2"] + params["b2"], 0.0)
    h = jnp.maximum(h @ params["w3"] + params["b3"], 0.0)
    logits = h @ params["w4"] + params["b4"]
    return jax.nn.log_softmax(logits, axis=1)


if __name__ == "__main__":
    key = jax.random.PRNGKey(0)
    k_params, k_x1, k_x2 = jax.random.split(key, 3)
    params = init_params(k_params)

    # 1) Exact-parity f32 path (small batch, single grid step): tight tolerance.
    B = 8
    x = jax.random.normal(k_x1, (B, IN_FEATURES), dtype=jnp.float32)
    out_f32 = jax.block_until_ready(net_forward(x, params, compute_dtype=jnp.float32))
    ref = reference_forward(x, params)
    assert out_f32.shape == (B, NUM_CLASSES)
    assert jnp.allclose(out_f32, ref, atol=1e-5, rtol=1e-5), "mismatch vs reference (f32 path)"

    # 2) Optimized bf16 streaming path (default): ragged batch, auto-tb -> grid of 2 steps.
    B2 = 300
    x2 = jax.random.normal(k_x2, (B2, IN_FEATURES), dtype=jnp.float32)
    out_bf16 = jax.block_until_ready(net_forward(x2, params))
    ref2 = reference_forward(x2, params)
    assert out_bf16.shape == (B2, NUM_CLASSES)
    assert jnp.allclose(out_bf16, ref2, atol=3e-2, rtol=2e-2), "mismatch vs reference (bf16 path)"

    # 3) bf16 path with an explicit small tile: exercises a 3-step grid + padded tail rows.
    out3 = jax.block_until_ready(net_forward(x2, params, tb=128))
    assert out3.shape == (B2, NUM_CLASSES)
    assert jnp.allclose(out3, ref2, atol=3e-2, rtol=2e-2), "mismatch vs reference (bf16 tiled)"

    print("KERNEL_OK")
</pallas_src>

<mosaic_0001>
module attributes {stable_mosaic.version = 11 : i64} {
  func.func @mlp_kernel(%arg0: i32, %arg1: memref<16x784xf32, #tpu.memory_space<vmem>>, %arg2: memref<784x128xf32, #tpu.memory_space<vmem>>, %arg3: memref<1x128xf32, #tpu.memory_space<vmem>>, %arg4: memref<128x128xf32, #tpu.memory_space<vmem>>, %arg5: memref<1x128xf32, #tpu.memory_space<vmem>>, %arg6: memref<128x128xf32, #tpu.memory_space<vmem>>, %arg7: memref<1x128xf32, #tpu.memory_space<vmem>>, %arg8: memref<128x128xf32, #tpu.memory_space<vmem>>, %arg9: memref<1x128xf32, #tpu.memory_space<vmem>>, %arg10: memref<16x128xf32, #tpu.memory_space<vmem>>) attributes {dimension_semantics = [#tpu.dimension_semantics<parallel>], iteration_bounds = array<i64: 1>, scalar_prefetch = 0 : i64, scratch_operands = 0 : i64, tpu.core_type = #tpu.core_type<tc>, window_params = [{transform_indices = @transform_0, window_bounds = array<i64: 16, 784>}, {pipeline_mode = #tpu.pipeline_mode<synchronous>, transform_indices = @transform_1, window_bounds = array<i64: 784, 128>}, {pipeline_mode = #tpu.pipeline_mode<synchronous>, transform_indices = @transform_2, window_bounds = array<i64: 1, 128>}, {pipeline_mode = #tpu.pipeline_mode<synchronous>, transform_indices = @transform_3, window_bounds = array<i64: 128, 128>}, {pipeline_mode = #tpu.pipeline_mode<synchronous>, transform_indices = @transform_4, window_bounds = array<i64: 1, 128>}, {pipeline_mode = #tpu.pipeline_mode<synchronous>, transform_indices = @transform_5, window_bounds = array<i64: 128, 128>}, {pipeline_mode = #tpu.pipeline_mode<synchronous>, transform_indices = @transform_6, window_bounds = array<i64: 1, 128>}, {pipeline_mode = #tpu.pipeline_mode<synchronous>, transform_indices = @transform_7, window_bounds = array<i64: 128, 128>}, {pipeline_mode = #tpu.pipeline_mode<synchronous>, transform_indices = @transform_8, window_bounds = array<i64: 1, 128>}, {transform_indices = @transform_9, window_bounds = array<i64: 16, 128>}]} {
    %c0 = arith.constant 0 : index
    %c0_0 = arith.constant 0 : index
    %0 = vector.load %arg1[%c0, %c0_0] : memref<16x784xf32, #tpu.memory_space<vmem>>, vector<16x784xf32>
    %c0_1 = arith.constant 0 : index
    %c0_2 = arith.constant 0 : index
    %1 = vector.load %arg2[%c0_1, %c0_2] : memref<784x128xf32, #tpu.memory_space<vmem>>, vector<784x128xf32>
    %cst = arith.constant dense<0.000000e+00> : vector<16x128xf32>
    %2 = tpu.matmul %0, %1, %cst {dimension_numbers = #tpu.dot_dimension_numbers<[1], [0], [0], [1], [0, 0, 1, 1], [], []>} : vector<16x784xf32>, vector<784x128xf32>, vector<16x128xf32> -> vector<16x128xf32>
    %c0_3 = arith.constant 0 : index
    %c0_4 = arith.constant 0 : index
    %3 = vector.load %arg3[%c0_3, %c0_4] : memref<1x128xf32, #tpu.memory_space<vmem>>, vector<1x128xf32>
    %4 = vector.broadcast %3 : vector<1x128xf32> to vector<16x128xf32>
    %5 = arith.addf %2, %4 : vector<16x128xf32>
    %cst_5 = arith.constant 0.000000e+00 : f32
    %6 = vector.broadcast %cst_5 : f32 to vector<16x128xf32>
    %7 = arith.maximumf %5, %6 : vector<16x128xf32>
    %c0_6 = arith.constant 0 : index
    %c0_7 = arith.constant 0 : index
    %8 = vector.load %arg4[%c0_6, %c0_7] : memref<128x128xf32, #tpu.memory_space<vmem>>, vector<128x128xf32>
    %cst_8 = arith.constant dense<0.000000e+00> : vector<16x128xf32>
    %9 = tpu.matmul %7, %8, %cst_8 {dimension_numbers = #tpu.dot_dimension_numbers<[1], [0], [0], [1], [0, 0, 1, 1], [], []>} : vector<16x128xf32>, vector<128x128xf32>, vector<16x128xf32> -> vector<16x128xf32>
    %c0_9 = arith.constant 0 : index
    %c0_10 = arith.constant 0 : index
    %10 = vector.load %arg5[%c0_9, %c0_10] : memref<1x128xf32, #tpu.memory_space<vmem>>, vector<1x128xf32>
    %11 = vector.broadcast %10 : vector<1x128xf32> to vector<16x128xf32>
    %12 = arith.addf %9, %11 : vector<16x128xf32>
    %cst_11 = arith.constant 0.000000e+00 : f32
    %13 = vector.broadcast %cst_11 : f32 to vector<16x128xf32>
    %14 = arith.maximumf %12, %13 : vector<16x128xf32>
    %c0_12 = arith.constant 0 : index
    %c0_13 = arith.constant 0 : index
    %15 = vector.load %arg6[%c0_12, %c0_13] : memref<128x128xf32, #tpu.memory_space<vmem>>, vector<128x128xf32>
    %cst_14 = arith.constant dense<0.000000e+00> : vector<16x128xf32>
    %16 = tpu.matmul %14, %15, %cst_14 {dimension_numbers = #tpu.dot_dimension_numbers<[1], [0], [0], [1], [0, 0, 1, 1], [], []>} : vector<16x128xf32>, vector<128x128xf32>, vector<16x128xf32> -> vector<16x128xf32>
    %c0_15 = arith.constant 0 : index
    %c0_16 = arith.constant 0 : index
    %17 = vector.load %arg7[%c0_15, %c0_16] : memref<1x128xf32, #tpu.memory_space<vmem>>, vector<1x128xf32>
    %18 = vector.broadcast %17 : vector<1x128xf32> to vector<16x128xf32>
    %19 = arith.addf %16, %18 : vector<16x128xf32>
    %cst_17 = arith.constant 0.000000e+00 : f32
    %20 = vector.broadcast %cst_17 : f32 to vector<16x128xf32>
    %21 = arith.maximumf %19, %20 : vector<16x128xf32>
    %c0_18 = arith.constant 0 : index
    %c0_19 = arith.constant 0 : index
    %22 = vector.load %arg8[%c0_18, %c0_19] : memref<128x128xf32, #tpu.memory_space<vmem>>, vector<128x128xf32>
    %cst_20 = arith.constant dense<0.000000e+00> : vector<16x128xf32>
    %23 = tpu.matmul %21, %22, %cst_20 {dimension_numbers = #tpu.dot_dimension_numbers<[1], [0], [0], [1], [0, 0, 1, 1], [], []>} : vector<16x128xf32>, vector<128x128xf32>, vector<16x128xf32> -> vector<16x128xf32>
    %c0_21 = arith.constant 0 : index
    %c0_22 = arith.constant 0 : index
    %24 = vector.load %arg9[%c0_21, %c0_22] : memref<1x128xf32, #tpu.memory_space<vmem>>, vector<1x128xf32>
    %25 = vector.broadcast %24 : vector<1x128xf32> to vector<16x128xf32>
    %26 = arith.addf %23, %25 : vector<16x128xf32>
    %cst_23 = arith.constant dense<0xFF800000> : vector<16xf32>
    %27 = vector.multi_reduction <maximumf>, %26, %cst_23 [1] : vector<16x128xf32> to vector<16xf32>
    %28 = vector.shape_cast %27 : vector<16xf32> to vector<16x1xf32>
    %29 = vector.broadcast %28 : vector<16x1xf32> to vector<16x128xf32>
    %30 = arith.subf %26, %29 : vector<16x128xf32>
    %31 = math.exp %30 : vector<16x128xf32>
    %cst_24 = arith.constant dense<0.000000e+00> : vector<16xf32>
    %32 = vector.multi_reduction <add>, %31, %cst_24 [1] : vector<16x128xf32> to vector<16xf32>
    %33 = vector.shape_cast %32 : vector<16xf32> to vector<16x1xf32>
    %34 = math.log %33 : vector<16x1xf32>
    %35 = vector.broadcast %34 : vector<16x1xf32> to vector<16x128xf32>
    %36 = arith.subf %30, %35 : vector<16x128xf32>
    %c0_25 = arith.constant 0 : index
    %c0_26 = arith.constant 0 : index
    %37 = vector.load %arg10[%c0_25, %c0_26] : memref<16x128xf32, #tpu.memory_space<vmem>>, vector<16x128xf32>
    tpu.vector_store %arg10[%c0_25, %c0_26], %36 {strides = array<i32>} : memref<16x128xf32, #tpu.memory_space<vmem>>, vector<16x128xf32>,
    return
  }
  func.func @transform_0(%arg0: i32) -> (i32, i32) {
    %c0_i32 = arith.constant 0 : i32
    %c0_i32_0 = arith.constant 0 : i32
    return %arg0, %c0_i32 : i32, i32
  }
  func.func @transform_1(%arg0: i32) -> (i32, i32) {
    %c0_i32 = arith.constant 0 : i32
    %c0_i32_0 = arith.constant 0 : i32
    %c0_i32_1 = arith.constant 0 : i32
    return %c0_i32, %c0_i32_0 : i32, i32
  }
  func.func @transform_2(%arg0: i32) -> (i32, i32) {
    %c0_i32 = arith.constant 0 : i32
    %c0_i32_0 = arith.constant 0 : i32
    %c0_i32_1 = arith.constant 0 : i32
    return %c0_i32, %c0_i32_0 : i32, i32
  }
  func.func @transform_3(%arg0: i32) -> (i32, i32) {
    %c0_i32 = arith.constant 0 : i32
    %c0_i32_0 = arith.constant 0 : i32
    %c0_i32_1 = arith.constant 0 : i32
    return %c0_i32, %c0_i32_0 : i32, i32
  }
  func.func @transform_4(%arg0: i32) -> (i32, i32) {
    %c0_i32 = arith.constant 0 : i32
    %c0_i32_0 = arith.constant 0 : i32
    %c0_i32_1 = arith.constant 0 : i32
    return %c0_i32, %c0_i32_0 : i32, i32
  }
  func.func @transform_5(%arg0: i32) -> (i32, i32) {
    %c0_i32 = arith.constant 0 : i32
    %c0_i32_0 = arith.constant 0 : i32
    %c0_i32_1 = arith.constant 0 : i32
    return %c0_i32, %c0_i32_0 : i32, i32
  }
  func.func @transform_6(%arg0: i32) -> (i32, i32) {
    %c0_i32 = arith.constant 0 : i32
    %c0_i32_0 = arith.constant 0 : i32
    %c0_i32_1 = arith.constant 0 : i32
    return %c0_i32, %c0_i32_0 : i32, i32
  }
  func.func @transform_7(%arg0: i32) -> (i32, i32) {
    %c0_i32 = arith.constant 0 : i32
    %c0_i32_0 = arith.constant 0 : i32
    %c0_i32_1 = arith.constant 0 : i32
    return %c0_i32, %c0_i32_0 : i32, i32
  }
  func.func @transform_8(%arg0: i32) -> (i32, i32) {
    %c0_i32 = arith.constant 0 : i32
    %c0_i32_0 = arith.constant 0 : i32
    %c0_i32_1 = arith.constant 0 : i32
    return %c0_i32, %c0_i32_0 : i32, i32
  }
  func.func @transform_9(%arg0: i32) -> (i32, i32) {
    %c0_i32 = arith.constant 0 : i32
    %c0_i32_0 = arith.constant 0 : i32
    return %arg0, %c0_i32 : i32, i32
  }
}

</mosaic_0001>

<bundles_post_ra>
// kernel: tpu_custom_call.1
= control target key start
LH: loop header
LB: loop body
LE: loop exit
PB: predicated region body
PF: predicated region fallthrough
CT: control target
= control target key end

     0   :  { %14 = vsyncpa [#allocation3], 0  ;;  %s872_s0 = inlined_call_operand.hbm [shape: f32[16,784], index: 0, kind: input, shape index: {}]   ;;  %s873_s1 = inlined_call_operand.hbm [shape: f32[784,128], index: 1, kind: input, shape index: {}]   ;;  %s874_s2 = inlined_call_operand.vmem [shape: f32[1,128], index: 2, kind: input, shape index: {}]   ;;  %s875_s3 = inlined_call_operand.hbm [shape: f32[128,128], index: 3, kind: input, shape index: {}]   ;;  %s876_s4 = inlined_call_operand.vmem [shape: f32[1,128], index: 4, kind: input, shape index: {}]   ;;  %s877_s5 = inlined_call_operand.hbm [shape: f32[128,128], index: 5, kind: input, shape index: {}]   ;;  %s878_s6 = inlined_call_operand.vmem [shape: f32[1,128], index: 6, kind: input, shape index: {}]   ;;  %s879_s7 = inlined_call_operand.hbm [shape: f32[128,128], index: 7, kind: input, shape index: {}]   ;;  %s880_s8 = inlined_call_operand.vmem [shape: f32[1,128], index: 8, kind: input, shape index: {}]   ;;  %s881_s9 = inlined_call_operand.hbm [shape: f32[16,128], index: 9, kind: output, shape index: {}]  }
   0x1   :  { %15 = vsyncpa [#allocation6], 0 }
   0x2   :  { %16 = vsyncpa [#allocation9], 0  ;;  %s35_s11 = sshll.u32 %s873_s1, 4  ;;  %s36_s11 = int_to_ptr.hbm [resolvable:$true] %s35_s11 }
   0x3   :  { %17 = vsyncpa [#allocation4], 0  ;;  %s765_s12 = smov [#allocation5]   ;;  %s65_s16 = sshll.u32 %s877_s5, 4  ;;  %s66_s16 = int_to_ptr.hbm [resolvable:$true] %s65_s16 }
   0x4   :  { %s37_s13 = sshll.u32 %s765_s12, 4  ;;  %s766_s17 = smov 128   ;;  %s38_s13 = int_to_ptr.vmem [resolvable:$true] %s37_s13 }
   0x5   :  { %s767_s18 = smov 8   ;;  %s768_s19 = smov [#allocation8]  }
   0x6   :  { %43 = dma.hbm_to_vmem [thread:$0]  %s36_s11, 12544, %s38_s13, [#allocation6], %s766_s17, %s766_s17, %s767_s18  }
   0x7   :  { %s67_s20 = sshll.u32 %s768_s19, 4  ;;  %s22_s22 = sshll.u32 %s872_s0, 4  ;;  %s68_s20 = int_to_ptr.vmem [resolvable:$true] %s67_s20  ;;  %s23_s22 = int_to_ptr.hbm [resolvable:$true] %s22_s22 }
   0x8   :  { %73 = dma.hbm_to_vmem [thread:$0]  %s66_s16, 2048, %s68_s20, [#allocation9], %s766_s17, %s766_s17, %s767_s18  }
   0x9   :  { %s769_s5 = smov [#allocation2]   ;;  %s50_s26 = sshll.u32 %s875_s3, 4  ;;  %s51_s26 = int_to_ptr.hbm [resolvable:$true] %s50_s26 }
   0xa   :  { %s24_s23 = sshll.u32 %s769_s5, 4  ;;  %s770_s27 = smov 896   ;;  %s25_s23 = int_to_ptr.vmem [resolvable:$true] %s24_s23 }
   0xb   :  { %s771_s28 = smov 56   ;;  %s772_s29 = smov [#allocation7]  }
   0xc   :  { %30 = dma.hbm_to_vmem [thread:$0]  %s23_s22, 1792, %s25_s23, [#allocation3], %s770_s27, %s770_s27, %s771_s28  }
   0xd   :  { %s52_s30 = sshll.u32 %s772_s29, 4  ;;  %s80_s11 = sshll.u32 %s879_s7, 4  ;;  %s53_s30 = int_to_ptr.vmem [resolvable:$true] %s52_s30  ;;  %s81_s11 = int_to_ptr.hbm [resolvable:$true] %s80_s11 }
   0xe   :  { %58 = dma.hbm_to_vmem [thread:$0]  %s51_s26, 2048, %s53_s30, [#allocation6], %s766_s17, %s766_s17, %s767_s18  }
   0xf   :  { %s773_s12 = smov [#allocation10]  }
  0x10   :  { %s82_s13 = sshll.u32 %s773_s12, 4  ;;  %s83_s13 = int_to_ptr.vmem [resolvable:$true] %s82_s13 }
  0x11   :  { %88 = dma.hbm_to_vmem [thread:$0]  %s81_s11, 2048, %s83_s13, [#allocation9], %s766_s17, %s766_s17, %s767_s18  }
  0x12   :  { %757 = dma.done.wait [#allocation3], 1792  }
  0x13   :  { %758 = vsyncadd [#allocation3], 4294965504 }
  0x14   :  { %759 = dma.done.wait [#allocation6], 14592  }
  0x15   :  { %760 = vsyncadd [#allocation6], 4294952704 }
  0x16   :  { %761 = dma.done.wait [#allocation9], 4096  }
  0x17   :  { %762 = vsyncadd [#allocation9], 4294963200  ;;  %v140_v0 = vld [vmem:[#allocation5 + $0x78] sm:$0xff]  ;;  %v139_v1 = vld [vmem:[#allocation5 + $0x70] sm:$0xff]  ;;  %vm227_vm0 = vcmask 130048   ;;  %s558_s1 = sshll.u32 %s881_s9, 4  ;;  %s559_s1 = int_to_ptr.hbm [resolvable:$true] %s558_s1 }
  0x18   :  { %v156_v2 = vld [vmem:[#allocation5 + $0xf8] sm:$0xff]  ;;  %234 = vmatpush.msra.mxu0 %v140_v0  ;;  %v155_v3 = vld [vmem:[#allocation5 + $0xf0] sm:$0xff]  ;;  %v138_v4 = vld [vmem:[#allocation5 + $0x68] sm:$0xff] }
  0x19   :  { %257 = vmatpush.msra.mxu1 %v156_v2  ;;  %v154_v5 = vld [vmem:[#allocation5 + $0xe8] sm:$0xff]  ;;  %v137_v6 = vld [vmem:[#allocation5 + $0x60] sm:$0xff]  ;;  %v172_v8 = vld [vmem:[#allocation5 + $0x178] sm:$0xff] }
  0x1a   :  { %235 = vmatpush.msra.mxu0 %v139_v1  ;;  %v153_v7 = vld [vmem:[#allocation5 + $0xe0] sm:$0xff]  ;;  %v171_v9 = vld [vmem:[#allocation5 + $0x170] sm:$0xff]  ;;  %v188_v10 = vld [vmem:[#allocation5 + $0x1f8] sm:$0xff]  ;;  %280 = vmatpush.msra.mxu2 %v172_v8 }
  0x1b   :  { %258 = vmatpush.msra.mxu1 %v155_v3  ;;  %v136_v11 = vld [vmem:[#allocation5 + $0x58] sm:$0xff]  ;;  %303 = vmatpush.msra.mxu3 %v188_v10  ;;  %v170_v13 = vld [vmem:[#allocation5 + $0x168] sm:$0xff]  ;;  %v187_v14 = vld [vmem:[#allocation5 + $0x1f0] sm:$0xff] }
  0x1c   :  { %236 = vmatpush.msra.mxu0 %v138_v4  ;;  %v152_v12 = vld [vmem:[#allocation5 + $0xd8] sm:$0xff]  ;;  %v135_v15 = vld [vmem:[#allocation5 + $0x50] sm:$0xff]  ;;  %281 = vmatpush.msra.mxu2 %v171_v9  ;;  %v186_v17 = vld [vmem:[#allocation5 + $0x1e8] sm:$0xff] }
  0x1d   :  { %259 = vmatpush.msra.mxu1 %v154_v5  ;;  %v151_v16 = vld [vmem:[#allocation5 + $0xd0] sm:$0xff]  ;;  %304 = vmatpush.msra.mxu3 %v187_v14  ;;  %v169_v18 = vld [vmem:[#allocation5 + $0x160] sm:$0xff]  ;;  %v134_v20 = vld [vmem:[#allocation5 + $0x48] sm:$0xff] }
  0x1e   :  { %237 = vmatpush.msra.mxu0 %v137_v6  ;;  %v185_v19 = vld [vmem:[#allocation5 + $0x1e0] sm:$0xff]  ;;  %v150_v21 = vld [vmem:[#allocation5 + $0xc8] sm:$0xff]  ;;  %282 = vmatpush.msra.mxu2 %v170_v13  ;;  %v168_v22 = vld [vmem:[#allocation5 + $0x158] sm:$0xff] }
  0x1f   :  { %260 = vmatpush.msra.mxu1 %v153_v7  ;;  %305 = vmatpush.msra.mxu3 %v186_v17  ;;  %v184_v23 = vld [vmem:[#allocation5 + $0x1d8] sm:$0xff]  ;;  %v133_v24 = vld [vmem:[#allocation5 + $0x40] sm:$0xff]  ;;  %v167_v26 = vld [vmem:[#allocation5 + $0x150] sm:$0xff] }
  0x20   :  { %238 = vmatpush.msra.mxu0 %v136_v11  ;;  %v149_v25 = vld [vmem:[#allocation5 + $0xc0] sm:$0xff]  ;;  %283 = vmatpush.msra.mxu2 %v169_v18  ;;  %v183_v27 = vld [vmem:[#allocation5 + $0x1d0] sm:$0xff]  ;;  %v132_v28 = vld [vmem:[#allocation5 + $0x38] sm:$0xff] }
  0x21   :  { %261 = vmatpush.msra.mxu1 %v152_v12  ;;  %306 = vmatpush.msra.mxu3 %v185_v19  ;;  %v148_v29 = vld [vmem:[#allocation5 + $0xb8] sm:$0xff]  ;;  %v166_v30 = vld [vmem:[#allocation5 + $0x148] sm:$0xff]  ;;  %v131_v32 = vld [vmem:[#allocation5 + $0x30] sm:$0xff] }
  0x22   :  { %239 = vmatpush.msra.mxu0 %v135_v15  ;;  %284 = vmatpush.msra.mxu2 %v168_v22  ;;  %v182_v31 = vld [vmem:[#allocation5 + $0x1c8] sm:$0xff]  ;;  %v147_v33 = vld [vmem:[#allocation5 + $0xb0] sm:$0xff]  ;;  %v165_v34 = vld [vmem:[#allocation5 + $0x140] sm:$0xff] }
  0x23   :  { %262 = vmatpush.msra.mxu1 %v151_v16  ;;  %307 = vmatpush.msra.mxu3 %v184_v23  ;;  %v181_v35 = vld [vmem:[#allocation5 + $0x1c0] sm:$0xff]  ;;  %v130_v36 = vld [vmem:[#allocation5 + $0x28] sm:$0xff]  ;;  %v164_v38 = vld [vmem:[#allocation5 + $0x138] sm:$0xff] }
  0x24   :  { %240 = vmatpush.msra.mxu0 %v134_v20  ;;  %285 = vmatpush.msra.mxu2 %v167_v26  ;;  %v146_v37 = vld [vmem:[#allocation5 + $0xa8] sm:$0xff]  ;;  %v180_v39 = vld [vmem:[#allocation5 + $0x1b8] sm:$0xff]  ;;  %v129_v40 = vld [vmem:[#allocation5 + $0x20] sm:$0xff] }
  0x25   :  { %263 = vmatpush.msra.mxu1 %v150_v21  ;;  %308 = vmatpush.msra.mxu3 %v183_v27  ;;  %v145_v41 = vld [vmem:[#allocation5 + $0xa0] sm:$0xff]  ;;  %v163_v42 = vld [vmem:[#allocation5 + $0x130] sm:$0xff]  ;;  %v128_v44 = vld [vmem:[#allocation5 + $0x18] sm:$0xff] }
  0x26   :  { %241 = vmatpush.msra.mxu0 %v133_v24  ;;  %286 = vmatpush.msra.mxu2 %v166_v30  ;;  %v179_v43 = vld [vmem:[#allocation5 + $0x1b0] sm:$0xff]  ;;  %v144_v45 = vld [vmem:[#allocation5 + $0x98] sm:$0xff]  ;;  %v162_v46 = vld [vmem:[#allocation5 + $0x128] sm:$0xff] }
  0x27   :  { %264 = vmatpush.msra.mxu1 %v149_v25  ;;  %309 = vmatpush.msra.mxu3 %v182_v31  ;;  %v178_v47 = vld [vmem:[#allocation5 + $0x1a8] sm:$0xff]  ;;  %v127_v48 = vld [vmem:[#allocation5 + $0x10] sm:$0xff]  ;;  %v161_v50 = vld [vmem:[#allocation5 + $0x120] sm:$0xff] }
  0x28   :  { %242 = vmatpush.msra.mxu0 %v132_v28  ;;  %287 = vmatpush.msra.mxu2 %v165_v34  ;;  %v143_v49 = vld [vmem:[#allocation5 + $0x90] sm:$0xff]  ;;  %v177_v51 = vld [vmem:[#allocation5 + $0x1a0] sm:$0xff]  ;;  %v126_v52 = vld [vmem:[#allocation5 + $0x8] sm:$0xff] }
  0x29   :  { %265 = vmatpush.msra.mxu1 %v148_v29  ;;  %310 = vmatpush.msra.mxu3 %v181_v35  ;;  %v142_v53 = vld [vmem:[#allocation5 + $0x88] sm:$0xff]  ;;  %v160_v54 = vld [vmem:[#allocation5 + $0x118] sm:$0xff]  ;;  %v125_v56 = vld [vmem:[#allocation5] sm:$0xff] }
  0x2a   :  { %243 = vmatpush.msra.mxu0 %v131_v32  ;;  %288 = vmatpush.msra.mxu2 %v164_v38  ;;  %v176_v55 = vld [vmem:[#allocation5 + $0x198] sm:$0xff]  ;;  %v141_v57 = vld [vmem:[#allocation5 + $0x80] sm:$0xff]  ;;  %v159_v60 = vld [vmem:[#allocation5 + $0x110] sm:$0xff] }
  0x2b   :  { %266 = vmatpush.msra.mxu1 %v147_v33  ;;  %311 = vmatpush.msra.mxu3 %v180_v39  ;;  %v204_v58 = vld [vmem:[#allocation5 + $0x278] sm:$0xff]  ;;  %v175_v61 = vld [vmem:[#allocation5 + $0x190] sm:$0xff]  ;;  %v158_v0 = vld [vmem:[#allocation5 + $0x108] sm:$0xff] }
  0x2c   :  { %244 = vmatpush.msra.mxu0 %v130_v36  ;;  %289 = vmatpush.msra.mxu2 %v163_v42  ;;  %v220_v59 = vld [vmem:[#allocation5 + $0x2f8] sm:$0xff]  ;;  %v203_v62 = vld [vmem:[#allocation5 + $0x270] sm:$0xff]  ;;  %v174_v1 = vld [vmem:[#allocation5 + $0x188] sm:$0xff] }
  0x2d   :  { %267 = vmatpush.msra.mxu1 %v146_v37  ;;  %312 = vmatpush.msra.mxu3 %v179_v43  ;;  %v219_v63 = vld [vmem:[#allocation5 + $0x2f0] sm:$0xff]  ;;  %v202_v2 = vld [vmem:[#allocation5 + $0x268] sm:$0xff]  ;;  %v157_v4 = vld [vmem:[#allocation5 + $0x100] sm:$0xff] }
  0x2e   :  { %245 = vmatpush.msra.mxu0 %v129_v40  ;;  %290 = vmatpush.msra.mxu2 %v162_v46  ;;  %v218_v3 = vld [vmem:[#allocation5 + $0x2e8] sm:$0xff]  ;;  %v173_v5 = vld [vmem:[#allocation5 + $0x180] sm:$0xff]  ;;  %v200_v7 = vld [vmem:[#allocation5 + $0x258] sm:$0xff] }
  0x2f   :  { %268 = vmatpush.msra.mxu1 %v145_v41  ;;  %313 = vmatpush.msra.mxu3 %v178_v47  ;;  %v201_v6 = vld [vmem:[#allocation5 + $0x260] sm:$0xff]  ;;  %v216_v9 = vld [vmem:[#allocation5 + $0x2d8] sm:$0xff]  ;;  %v111_v11 = vld [vmem:[#allocation2] sm:$0xff] }
  0x30   :  { %246 = vmatpush.msra.mxu0 %v128_v44  ;;  %291 = vmatpush.msra.mxu2 %v161_v50  ;;  %v217_v8 = vld [vmem:[#allocation5 + $0x2e0] sm:$0xff]  ;;  %v222_v12 = vld [vmem:[#allocation5 + $0x308] sm:$0xff]  ;;  %v199_v14 = vld [vmem:[#allocation5 + $0x250] sm:$0xff] }
  0x31   :  { %269 = vmatpush.msra.mxu1 %v144_v45  ;;  %314 = vmatpush.msra.mxu3 %v177_v51  ;;  %v113_v10 = vld [vmem:[#allocation2 + $0x10] sm:$0xff]  ;;  %v114_v13 = vld [vmem:[#allocation2 + $0x18] sm:$0xff]  ;;  %v215_v15 = vld [vmem:[#allocation5 + $0x2d0] sm:$0xff] }
  0x32   :  { %247 = vmatpush.msra.mxu0 %v127_v48  ;;  %292 = vmatpush.msra.mxu2 %v160_v54  ;;  %v112_v16 = vld [vmem:[#allocation2 + $0x8] sm:$0xff]  ;;  %v221_v17 = vld [vmem:[#allocation5 + $0x300] sm:$0xff]  ;;  %v198_v18 = vld [vmem:[#allocation5 + $0x248] sm:$0xff] }
  0x33   :  { %270 = vmatpush.msra.mxu1 %v143_v49  ;;  %315 = vmatpush.msra.mxu3 %v176_v55  ;;  %v214_v19 = vld [vmem:[#allocation5 + $0x2c8] sm:$0xff]  ;;  %v197_v21 = vld [vmem:[#allocation5 + $0x240] sm:$0xff]  ;;  %v120_v23 = vld [vmem:[#allocation2 + $0x48] sm:$0xff] }
  0x34   :  { %248 = vmatpush.msra.mxu0 %v126_v52  ;;  %293 = vmatpush.msra.mxu2 %v159_v60  ;;  %v412_v20 = vld [vmem:[#allocation7 + $0x78] sm:$0xff]  ;;  %v213_v22 = vld [vmem:[#allocation5 + $0x2c0] sm:$0xff]  ;;  %v196_v25 = vld [vmem:[#allocation5 + $0x238] sm:$0xff] }
  0x35   :  { %271 = vmatpush.msra.mxu1 %v142_v53  ;;  %316 = vmatpush.msra.mxu3 %v175_v61  ;;  %v118_v24 = vld [vmem:[#allocation2 + $0x38] sm:$0xff]  ;;  %v212_v26 = vld [vmem:[#allocation5 + $0x2b8] sm:$0xff]  ;;  %v121_v27 = vld [vmem:[#allocation2 + $0x50] sm:$0xff] }
  0x36   :  { %249 = vmatpush.msra.mxu0 %v125_v56  ;;  %294 = vmatpush.msra.mxu2 %v158_v0  ;;  %v195_v28 = vld [vmem:[#allocation5 + $0x230] sm:$0xff]  ;;  %v411_v31 = vld [vmem:[#allocation7 + $0x70] sm:$0xff]  ;;  %v194_v32 = vld [vmem:[#allocation5 + $0x228] sm:$0xff] }
  0x37   :  { %272 = vmatpush.msra.mxu1 %v141_v57  ;;  %317 = vmatpush.msra.mxu3 %v174_v1  ;;  %v211_v29 = vld [vmem:[#allocation5 + $0x2b0] sm:$0xff]  ;;  %v210_v33 = vld [vmem:[#allocation5 + $0x2a8] sm:$0xff]  ;;  %v410_v34 = vld [vmem:[#allocation7 + $0x68] sm:$0xff] }
  0x38   :  { %326 = vmatpush.msrb.mxu0 %v204_v58  ;;  %295 = vmatpush.msra.mxu2 %v157_v4  ;;  %v119_v30 = vld [vmem:[#allocation2 + $0x40] sm:$0xff]  ;;  %v193_v35 = vld [vmem:[#allocation5 + $0x220] sm:$0xff]  ;;  %v192_v38 = vld [vmem:[#allocation5 + $0x218] sm:$0xff] }
  0x39   :  { %349 = vmatpush.msrb.mxu1 %v220_v59  ;;  %318 = vmatpush.msra.mxu3 %v173_v5  ;;  %v209_v36 = vld [vmem:[#allocation5 + $0x2a0] sm:$0xff]  ;;  %v208_v39 = vld [vmem:[#allocation5 + $0x298] sm:$0xff]  ;;  %v191_v40 = vld [vmem:[#allocation5 + $0x210] sm:$0xff] }
  0x3a   :  { %327 = vmatpush.msrb.mxu0 %v203_v62  ;;  %296 = vmatmul.f32.vlgmr.msra.gmra.mxu2 %v113_v10  ;;  %v117_v37 = vld [vmem:[#allocation2 + $0x30] sm:$0xff]  ;;  %v207_v41 = vld [vmem:[#allocation5 + $0x290] sm:$0xff]  ;;  %v190_v42 = vld [vmem:[#allocation5 + $0x208] sm:$0xff] }
  0x3b   :  { %350 = vmatpush.msrb.mxu1 %v219_v63  ;;  %250 = vmatmul.f32.vlgmr.msra.gmra.mxu0 %v111_v11  ;;  %v206_v43 = vld [vmem:[#allocation5 + $0x288] sm:$0xff]  ;;  %v189_v44 = vld [vmem:[#allocation5 + $0x200] sm:$0xff]  ;;  %v115_v46 = vld [vmem:[#allocation2 + $0x20] sm:$0xff] }
  0x3c   :  { %328 = vmatpush.msrb.mxu0 %v202_v2  ;;  %386 = vmatpush.msrb.mxu2 %v222_v12  ;;  %v205_v45 = vld [vmem:[#allocation5 + $0x280] sm:$0xff]  ;;  %v116_v47 = vld [vmem:[#allocation2 + $0x28] sm:$0xff]  ;;  %v122_v49 = vld [vmem:[#allocation2 + $0x58] sm:$0xff] }
  0x3d   :  { %351 = vmatpush.msrb.mxu1 %v218_v3  ;;  %319 = vmatmul.f32.vlgmr.msra.gmra.mxu3 %v114_v13  ;;  %v124_v48 = vld [vmem:[#allocation2 + $0x68] sm:$0xff]  ;;  %v123_v50 = vld [vmem:[#allocation2 + $0x60] sm:$0xff]  ;;  %v408_v52 = vld [vmem:[#allocation7 + $0x58] sm:$0xff] }
  0x3e   :  { %329 = vmatpush.msrb.mxu0 %v201_v6  ;;  %273 = vmatmul.f32.vlgmr.msra.gmra.mxu1 %v112_v16  ;;  %v409_v51 = vld [vmem:[#allocation7 + $0x60] sm:$0xff]  ;;  %v407_v53 = vld [vmem:[#allocation7 + $0x50] sm:$0xff]  ;;  %v406_v54 = vld [vmem:[#allocation7 + $0x48] sm:$0xff] }
  0x3f   :  { %352 = vmatpush.msrb.mxu1 %v217_v8  ;;  %387 = vmatpush.msrb.mxu2 %v221_v17  ;;  %v405_v55 = vld [vmem:[#allocation7 + $0x40] sm:$0xff]  ;;  %v404_v56 = vld [vmem:[#allocation7 + $0x38] sm:$0xff]  ;;  %v403_v57 = vld [vmem:[#allocation7 + $0x30] sm:$0xff] }
  0x40   :  { %330 = vmatpush.msrb.mxu0 %v200_v7  ;;  %417 = vmatpush.msrb.mxu3 %v412_v20  ;;  %v402_v58 = vld [vmem:[#allocation7 + $0x28] sm:$0xff]  ;;  %v401_v59 = vld [vmem:[#allocation7 + $0x20] sm:$0xff]  ;;  %v400_v60 = vld [vmem:[#allocation7 + $0x18] sm:$0xff] }
  0x41   :  { %353 = vmatpush.msrb.mxu1 %v216_v9  ;;  %v399_v61 = vld [vmem:[#allocation7 + $0x10] sm:$0xff]  ;;  %v398_v62 = vld [vmem:[#allocation7 + $0x8] sm:$0xff]  ;;  %v397_v63 = vld [vmem:[#allocation7] sm:$0xff] }
  0x42   :  { %331 = vmatpush.msrb.mxu0 %v199_v14  ;;  %299 = vmatmul.f32.gmra.mxu2 %v120_v23  ;;  %v601_v3 = vld [vmem:[%s874_s2] ss:$0 sm:$0xff]  ;;  %v457_v4 = vld [vmem:[#allocation8 + $0x78] sm:$0xff]  ;;  %v456_v5 = vld [vmem:[#allocation8 + $0x70] sm:$0xff] }
  0x43   :  { %354 = vmatpush.msrb.mxu1 %v215_v15  ;;  %253 = vmatmul.f32.gmra.mxu0 %v118_v24  ;;  %v455_v7 = vld [vmem:[#allocation8 + $0x68] sm:$0xff]  ;;  %v454_v9 = vld [vmem:[#allocation8 + $0x60] sm:$0xff]  ;;  %v453_v13 = vld [vmem:[#allocation8 + $0x58] sm:$0xff] }
  0x44   :  { %332 = vmatpush.msrb.mxu0 %v198_v18  ;;  %418 = vmatpush.msrb.mxu3 %v411_v31  ;;  %v452_v14 = vld [vmem:[#allocation8 + $0x50] sm:$0xff]  ;;  %v451_v18 = vld [vmem:[#allocation8 + $0x48] sm:$0xff]  ;;  %v449_v23 = vld [vmem:[#allocation8 + $0x38] sm:$0xff] }
  0x45   :  { %355 = vmatpush.msrb.mxu1 %v214_v19  ;;  %322 = vmatmul.f32.gmra.mxu3 %v121_v27  ;;  %v450_v19 = vld [vmem:[#allocation8 + $0x40] sm:$0xff]  ;;  %v448_v27 = vld [vmem:[#allocation8 + $0x30] sm:$0xff] }
  0x46   :  { %333 = vmatpush.msrb.mxu0 %v197_v21  ;;  %276 = vmatmul.f32.gmra.mxu1 %v119_v30  ;;  %v447_v30 = vld [vmem:[#allocation8 + $0x28] sm:$0xff] }
  0x47   :  { %356 = vmatpush.msrb.mxu1 %v213_v22  ;;  %419 = vmatpush.msrb.mxu3 %v410_v34 }
  0x48   :  { %334 = vmatpush.msrb.mxu0 %v196_v25  ;;  %462 = vmatpush.msra.mxu2 %v457_v4  ;;  %v488_v4 = vld [vmem:[#allocation10 + $0x8] sm:$0xff] }
  0x49   :  { %357 = vmatpush.msrb.mxu1 %v212_v26  ;;  %420 = vmatpush.msrb.mxu3 %v409_v51  ;;  %v498_v51 = vld [vmem:[#allocation10 + $0x58] sm:$0xff] }
  0x4a   :  { %335 = vmatpush.msrb.mxu0 %v195_v28  ;;  %573 = vmatmul.msk.f32.vlgmr.msrb.gmra.mxu2 %vm227_vm0, %v117_v37 }
  0x4b   :  { %358 = vmatpush.msrb.mxu1 %v211_v29  ;;  %421 = vmatpush.msrb.mxu3 %v408_v52  ;;  %v497_v52 = vld [vmem:[#allocation10 + $0x50] sm:$0xff] }
  0x4c   :  { %336 = vmatpush.msrb.mxu0 %v194_v32  ;;  %463 = vmatpush.msra.mxu2 %v456_v5  ;;  %v487_v5 = vld [vmem:[#allocation10] sm:$0xff] }
  0x4d   :  { %359 = vmatpush.msrb.mxu1 %v210_v33  ;;  %422 = vmatpush.msrb.mxu3 %v407_v53  ;;  %v446_v33 = vld [vmem:[#allocation8 + $0x20] sm:$0xff]  ;;  %v496_v53 = vld [vmem:[#allocation10 + $0x48] sm:$0xff] }
  0x4e   :  { %337 = vmatpush.msrb.mxu0 %v193_v35  ;;  %464 = vmatpush.msra.mxu2 %v455_v7 }
  0x4f   :  { %360 = vmatpush.msrb.mxu1 %v209_v36  ;;  %423 = vmatpush.msrb.mxu3 %v406_v54  ;;  %v445_v36 = vld [vmem:[#allocation8 + $0x18] sm:$0xff]  ;;  %v495_v54 = vld [vmem:[#allocation10 + $0x40] sm:$0xff] }
  0x50   :  { %338 = vmatpush.msrb.mxu0 %v192_v38  ;;  %465 = vmatpush.msra.mxu2 %v454_v9 }
  0x51   :  { %361 = vmatpush.msrb.mxu1 %v208_v39  ;;  %424 = vmatpush.msrb.mxu3 %v405_v55  ;;  %v494_v55 = vld [vmem:[#allocation10 + $0x38] sm:$0xff] }
  0x52   :  { %339 = vmatpush.msrb.mxu0 %v191_v40  ;;  %574 = vmatmul.msk.f32.gmra.mxu2 %vm227_vm0, %v124_v48  ;;  %v501_v48 = vld [vmem:[#allocation10 + $0x70] sm:$0xff] }
  0x53   :  { %362 = vmatpush.msrb.mxu1 %v207_v41  ;;  %425 = vmatpush.msrb.mxu3 %v404_v56  ;;  %v602_v56 = vld [vmem:[%s876_s4] ss:$0 sm:$0xff] }
  0x54   :  { %340 = vmatpush.msrb.mxu0 %v190_v42  ;;  %466 = vmatpush.msra.mxu2 %v453_v13  ;;  %v604_v13 = vld [vmem:[%s880_s8] ss:$0 sm:$0xff] }
  0x55   :  { %363 = vmatpush.msrb.mxu1 %v206_v43  ;;  %426 = vmatpush.msrb.mxu3 %v403_v57  ;;  %v493_v57 = vld [vmem:[#allocation10 + $0x30] sm:$0xff] }
  0x56   :  { %341 = vmatpush.msrb.mxu0 %v189_v44  ;;  %467 = vmatpush.msra.mxu2 %v452_v14  ;;  %v444_v44 = vld [vmem:[#allocation8 + $0x10] sm:$0xff] }
  0x57   :  { %364 = vmatpush.msrb.mxu1 %v205_v45  ;;  %342 = vmatmul.f32.vlgmr.msrb.gmra.mxu0 %v115_v46  ;;  %v443_v45 = vld [vmem:[#allocation8 + $0x8] sm:$0xff]  ;;  %v442_v46 = vld [vmem:[#allocation8] sm:$0xff] }
  0x58   :  { %365 = vmatmul.f32.vlgmr.msrb.gmra.mxu1 %v116_v47  ;;  %427 = vmatpush.msrb.mxu3 %v402_v58  ;;  %v502_v47 = vld [vmem:[#allocation10 + $0x78] sm:$0xff]  ;;  %v492_v58 = vld [vmem:[#allocation10 + $0x28] sm:$0xff] }
  0x59   :  { %468 = vmatpush.msra.mxu2 %v451_v18  ;;  %507 = vmatpush.msra.mxu0 %v502_v47 }
  0x5a   :  { %428 = vmatpush.msrb.mxu3 %v401_v59  ;;  %575 = vmatpush.msra.mxu1 %v502_v47 }
  0x5b   :  { %469 = vmatpush.msra.mxu2 %v450_v19  ;;  %508 = vmatpush.msra.mxu0 %v501_v48 }
  0x5c   :  { %429 = vmatpush.msrb.mxu3 %v400_v60  ;;  %576 = vmatpush.msra.mxu1 %v501_v48 }
  0x5d   :  { %470 = vmatpush.msra.mxu2 %v449_v23 }
  0x5e   :  { %430 = vmatpush.msrb.mxu3 %v399_v61  ;;  %v491_v61 = vld [vmem:[#allocation10 + $0x20] sm:$0xff] }
  0x5f   :  { %345 = vmatmul.f32.gmra.mxu0 %v122_v49  ;;  %471 = vmatpush.msra.mxu2 %v448_v27  ;;  %v500_v49 = vld [vmem:[#allocation10 + $0x68] sm:$0xff] }
  0x60   :  { %368 = vmatmul.f32.gmra.mxu1 %v123_v50  ;;  %431 = vmatpush.msrb.mxu3 %v398_v62  ;;  %v499_v50 = vld [vmem:[#allocation10 + $0x60] sm:$0xff] }
  0x61   :  { %472 = vmatpush.msra.mxu2 %v447_v30  ;;  %509 = vmatpush.msra.mxu0 %v500_v49 }
  0x62   :  { %432 = vmatpush.msrb.mxu3 %v397_v63  ;;  %577 = vmatpush.msra.mxu1 %v500_v49  ;;  %v490_v63 = vld [vmem:[#allocation10 + $0x18] sm:$0xff] }
  0x63   :  { %473 = vmatpush.msra.mxu2 %v446_v33  ;;  %510 = vmatpush.msra.mxu0 %v499_v50 }
  0x64   :  { %578 = vmatpush.msra.mxu1 %v499_v50 }
  0x65   :  { %474 = vmatpush.msra.mxu2 %v445_v36  ;;  %511 = vmatpush.msra.mxu0 %v498_v51 }
  0x66   :  { %579 = vmatpush.msra.mxu1 %v498_v51 }
  0x67   :  { %475 = vmatpush.msra.mxu2 %v444_v44  ;;  %512 = vmatpush.msra.mxu0 %v497_v52 }
  0x68   :  { %580 = vmatpush.msra.mxu1 %v497_v52 }
  0x69   :  { %476 = vmatpush.msra.mxu2 %v443_v45  ;;  %513 = vmatpush.msra.mxu0 %v496_v53 }
  0x6a   :  { %581 = vmatpush.msra.mxu1 %v496_v53 }
  0x6b   :  { %477 = vmatpush.msra.mxu2 %v442_v46  ;;  %514 = vmatpush.msra.mxu0 %v495_v54 }
  0x6c   :  { %582 = vmatpush.msra.mxu1 %v495_v54 }
  0x6d   :  { %515 = vmatpush.msra.mxu0 %v494_v55 }
  0x6e   :  { %583 = vmatpush.msra.mxu1 %v494_v55 }
  0x6f   :  { %516 = vmatpush.msra.mxu0 %v493_v57 }
  0x70   :  { %584 = vmatpush.msra.mxu1 %v493_v57 }
  0x71   :  { %517 = vmatpush.msra.mxu0 %v492_v58 }
  0x72   :  { %585 = vmatpush.msra.mxu1 %v492_v58 }
  0x73   :  { %518 = vmatpush.msra.mxu0 %v491_v61 }
  0x74   :  { %586 = vmatpush.msra.mxu1 %v491_v61 }
  0x75   :  { %519 = vmatpush.msra.mxu0 %v490_v63 }
  0x76   :  { %587 = vmatpush.msra.mxu1 %v490_v63 }
  0xb8   :  { %v251_v0 = vpop.f32.mrf.mxu0 }
  0xb9   :  { %v252_v6 = vadd.f32 %v601_v3, %v251_v0 }
  0xbb   :  { %v274_v1 = vpop.f32.mrf.mxu1 }
  0xbc   :  { %v275_v12 = vadd.f32 %v274_v1, %v252_v6  ;;  %v603_v6 = vld [vmem:[%s878_s6] ss:$0 sm:$0xff]  ;;  %s774_s6 = smov [#allocation11]  }
  0xbd   :  { %v297_v2 = vpop.f32.mrf.mxu2  ;;  %s556_s8 = sshll.u32 %s774_s6, 4  ;;  %s557_s8 = int_to_ptr.vmem [resolvable:$true] %s556_s8 }
  0xbe   :  { %v298_v16 = vadd.f32 %v297_v2, %v275_v12 }
  0xc0   :  { %v254_v8 = vpop.f32.mrf.mxu0  ;;  %v320_v15 = vpop.f32.mrf.mxu3 }
  0xc1   :  { %v255_v17 = vadd.f32 %v601_v3, %v254_v8  ;;  %v321_v20 = vadd.f32 %v320_v15, %v298_v16  ;;  %v489_v3 = vld [vmem:[#allocation10 + $0x10] sm:$0xff] }
  0xc2   :  { %520 = vmatpush.msra.mxu0 %v489_v3  ;;  %588 = vmatpush.msra.mxu1 %v489_v3 }
  0xc3   :  { %v277_v10 = vpop.f32.mrf.mxu1 }
  0xc4   :  { %v278_v21 = vadd.f32 %v277_v10, %v255_v17  ;;  %521 = vmatpush.msra.mxu0 %v488_v4  ;;  %589 = vmatpush.msra.mxu1 %v488_v4 }
  0xc5   :  { %v300_v11 = vpop.f32.mrf.mxu2 }
  0xc6   :  { %v301_v28 = vadd.f32 %v300_v11, %v278_v21  ;;  %522 = vmatpush.msra.mxu0 %v487_v5  ;;  %590 = vmatpush.msra.mxu1 %v487_v5 }
  0xc8   :  { %v323_v31 = vpop.f32.mrf.mxu3 }
  0xc9   :  { %v324_v34 = vadd.f32 %v323_v31, %v301_v28 }
  0xcd   :  { %v389_v22 = vpop.f32.mrf.mxu2 }
  0xd4   :  { %v343_v24 = vpop.f32.mrf.mxu0 }
  0xd5   :  { %v366_v25 = vpop.f32.mrf.mxu1  ;;  %v344_v26 = vadd.f32 %v343_v24, %v321_v20  ;;  %v392_v40 = vpop.f32.mrf.mxu2 }
  0xd7   :  { %v367_v29 = vadd.f32 %v366_v25, %v344_v26 }
  0xd9   :  { %v390_v32 = vadd.f32 %v389_v22, %v367_v29 }
  0xdb   :  { %v395_v35 = vmax.f32 %v390_v32, 0.0 }
  0xdc   :  { %v346_v37 = vpop.f32.mrf.mxu0 }
  0xdd   :  { %v369_v38 = vpop.f32.mrf.mxu1  ;;  %v347_v39 = vadd.f32 %v346_v37, %v324_v34  ;;  %433 = vmatmul.f32.vlgmr.msrb.gmra.mxu3 %v395_v35 }
  0xdf   :  { %v370_v41 = vadd.f32 %v369_v38, %v347_v39 }
  0xe1   :  { %v393_v42 = vadd.f32 %v392_v40, %v370_v41 }
  0xe3   :  { %v396_v43 = vmax.f32 %v393_v42, 0.0 }
  0xe5   :  { %436 = vmatmul.f32.gmra.mxu3 %v396_v43 }
 0x160   :  { %v434_v59 = vpop.f32.mrf.mxu3 }
 0x161   :  { %v435_v60 = vadd.f32 %v602_v56, %v434_v59 }
 0x163   :  { %v440_v62 = vmax.f32 %v435_v60, 0.0 }
 0x165   :  { %478 = vmatmul.f32.vlgmr.msra.gmra.mxu2 %v440_v62 }
 0x168   :  { %v437_v0 = vpop.f32.mrf.mxu3 }
 0x169   :  { %v438_v1 = vadd.f32 %v602_v56, %v437_v0 }
 0x16b   :  { %v441_v2 = vmax.f32 %v438_v1, 0.0 }
 0x16d   :  { %481 = vmatmul.f32.gmra.mxu2 %v441_v2 }
 0x1e8   :  { %v479_v7 = vpop.f32.mrf.mxu2 }
 0x1e9   :  { %v480_v8 = vadd.f32 %v603_v6, %v479_v7 }
 0x1eb   :  { %v485_v9 = vmax.f32 %v480_v8, 0.0 }
 0x1ed   :  { %523 = vmatmul.f32.vlgmr.msra.gmra.mxu0 %v485_v9 }
 0x1f0   :  { %v482_v10 = vpop.f32.mrf.mxu2 }
 0x1f1   :  { %v483_v11 = vadd.f32 %v603_v6, %v482_v10 }
 0x1f3   :  { %v486_v12 = vmax.f32 %v483_v11, 0.0 }
 0x1f5   :  { %526 = vmatmul.f32.vlgmr.msra.gmra.mxu1 %v486_v12 }
 0x26a   :  { %v524_v14 = vpop.f32.mrf.mxu0 }
 0x26b   :  { %v525_v15 = vadd.f32 %v604_v13, %v524_v14 }
 0x26d   :  { %530 = vmax.xlane.f32.xlu0 %v525_v15 }
 0x272   :  { %v527_v16 = vpop.f32.mrf.mxu1 }
 0x273   :  { %v528_v17 = vadd.f32 %v604_v13, %v527_v16 }
 0x275   :  { %532 = vmax.xlane.f32.xlu0 %v528_v17 }
 0x2e0   :  { %v531_v18 = vpop.xlane.xlu0 %530 }
 0x2e1   :  { %v534_v19 = vsub.f32 %v525_v15, %v531_v18 }
 0x2e3   :  { %v536_v20 = vmul.f32 1.442695, %v534_v19 }
 0x2e5   :  { %605 = vpow2.f32 %v536_v20 }
 0x2e8   :  { %v533_v21 = vpop.xlane.xlu0 %532 }
 0x2e9   :  { %v535_v22 = vsub.f32 %v528_v17, %v533_v21 }
 0x2eb   :  { %v606_v23 = vpop.eup %605  ;;  %v538_v24 = vmul.f32 1.442695, %v535_v22 }
 0x2ec   :  { %540 = vadd.xlane.f32.xlu1 %v606_v23 }
 0x2ed   :  { %607 = vpow2.f32 %v538_v24 }
 0x2f3   :  { %v608_v25 = vpop.eup %607 }
 0x2f4   :  { %542 = vadd.xlane.f32.xlu1 %v608_v25 }
 0x35f   :  { %v541_v26 = vpop.xlane.xlu1 %540 }
 0x360   :  { %609 = vlog2.f32 %v541_v26 }
 0x366   :  { %v610_v27 = vpop.eup %609 }
 0x367   :  { %v545_v28 = vmul.f32 0.6931472, %v610_v27  ;;  %v543_v29 = vpop.xlane.xlu1 %542 }
 0x368   :  { %611 = vlog2.f32 %v543_v29 }
 0x369   :  { %v548_v30 = vsub.f32 %v534_v19, %v545_v28 }
 0x36b   :  { %550 = vst [vmem:[#allocation11] sm:$0xff] %v548_v30 }
 0x36e   :  { %v612_v31 = vpop.eup %611 }
 0x36f   :  { %v547_v32 = vmul.f32 0.6931472, %v612_v31 }
 0x371   :  { %v549_v33 = vsub.f32 %v535_v22, %v547_v32 }
 0x373   :  { %551 = vst [vmem:[#allocation11 + $0x8] sm:$0xff] %v549_v33 }
 0x374   :  { %564 = dma.vmem_to_hbm [thread:$0]  %s557_s8, 256, %s559_s1, [#allocation4], %s766_s17, %s766_s17, %s767_s18  }
 0x375   :  { %763 = dma.done.wait [#allocation4], 256  }
 0x376   :  { %764 = vsyncadd [#allocation4], 4294967040 }
 0x377   :  { %569 = vsyncpa [#allocation3], 1 }
 0x378   :  { %570 = vsyncpa [#allocation6], 1 }
 0x379   :  { %571 = vsyncpa [#allocation9], 1 }
 0x37a   :  { %572 = vsyncpa [#allocation4], 1 }

</bundles_post_ra>
